<compile_context>
chip_gen: v7x
topology: tpu7x:2x2x1
jax: 0.10.0
libtpu: 0.0.40
codegen_flags: <defaults>
</compile_context>

<pallas_src>
import math
from typing import NamedTuple

import jax
import jax.numpy as jnp
from jax.experimental import pallas as pl
from jax.experimental.pallas import tpu as pltpu

H1 = 128
H2 = 256


def _round_up(x, m):
    return ((x + m - 1) // m) * m


def _dqn_kernel(x_ref, w1_ref, b1_ref, w2_ref, b2_ref, w3_ref, b3_ref, o_ref):
    mxu_dtype = w1_ref.dtype  # f32 or bf16; accumulation is always f32.

    # fc1 + ReLU
    h1 = jnp.dot(x_ref[...], w1_ref[...], preferred_element_type=jnp.float32)
    h1 = jnp.maximum(h1 + b1_ref[...], 0.0).astype(mxu_dtype)
    # fc2 + ReLU
    h2 = jnp.dot(h1, w2_ref[...], preferred_element_type=jnp.float32)
    h2 = jnp.maximum(h2 + b2_ref[...], 0.0).astype(mxu_dtype)
    # fc3 (no activation)
    out = jnp.dot(h2, w3_ref[...], preferred_element_type=jnp.float32)
    o_ref[...] = (out + b3_ref[...]).astype(o_ref.dtype)


class PreparedDQNParams(NamedTuple):
    w1: jax.Array   # (K,  128)  mxu_dtype
    b1: jax.Array   # (1,  128)  f32
    w2: jax.Array   # (128,256)  mxu_dtype
    b2: jax.Array   # (1,  256)  f32
    w3: jax.Array   # (256, n_pad) mxu_dtype, lane-padded to multiple of 128
    b3: jax.Array   # (1,   n_pad) f32
    out_dim: int    # logical (unpadded) number of actions


def prepare_dqn_params(params, mxu_dtype=jnp.bfloat16):
    """One-time prep (at init / after each param update): lane-pad the last
    layer to a multiple of 128 columns and cast matmul operands to the MXU
    dtype, so dqn_forward does zero weight padding / conversion per call."""
    w1, b1, w2, b2, w3, b3 = params
    out_dim = w3.shape[1]
    n_pad = _round_up(out_dim, 128)
    if n_pad != out_dim:
        w3 = jnp.pad(w3, ((0, 0), (0, n_pad - out_dim)))
        b3 = jnp.pad(b3, ((0, 0), (0, n_pad - out_dim)))
    return PreparedDQNParams(
        w1=w1.astype(mxu_dtype),
        b1=b1.astype(jnp.float32),
        w2=w2.astype(mxu_dtype),
        b2=b2.astype(jnp.float32),
        w3=w3.astype(mxu_dtype),
        b3=b3.astype(jnp.float32),
        out_dim=out_dim,
    )


def dqn_forward(state, prep: PreparedDQNParams, *, batch_tile=1024,
                out_dtype=jnp.float32):
    """Fused 3-layer MLP forward: relu(x@W1+b1) -> relu(@W2+b2) -> @W3+b3."""
    B, K = state.shape
    mxu_dtype = prep.w1.dtype
    h1 = prep.w1.shape[1]
    h2 = prep.w2.shape[1]
    n_pad = prep.w3.shape[1]
    assert prep.w1.shape[0] == K, "state feature dim must match fc1 weights"

    # Ideally the caller already supplies state in the MXU dtype; cast if not.
    if state.dtype != mxu_dtype:
        state = state.astype(mxu_dtype)

    # ---- batch tiling -------------------------------------------------------
    # Tiles are 16-row aligned (bf16 packs 16 sublanes/vreg).  For B >= 32,
    # cap the tile at ceil(B/2) so the grid has >= 2 "parallel" steps (v7x
    # megacore); batch_tile (default 1024) bounds the tile for large B so the
    # ~0.35us/step overhead is well amortized.  VMEM is not the constraint
    # (total working set < 10 MB even at tb=2048 on v5e/v6e/v7x).
    if B < 32:
        b_run = _round_up(max(B, 16), 16)
        if b_run != B:
            state = jnp.pad(state, ((0, b_run - B), (0, 0)))  # tiny, negligible
        tb = b_run
    else:
        b_run = B                                   # no HBM copy of the batch
        tb = min(batch_tile, _round_up(pl.cdiv(B, 2), 16))    # tb <= B here
    grid_b = pl.cdiv(b_run, tb)   # ragged last block: OOB reads unspecified,
                                  # OOB writes dropped (rows are independent).

    resident = lambda i: (0, 0)   # weights/biases stay VMEM-resident across steps

    out = pl.pallas_call(
        _dqn_kernel,
        out_shape=jax.ShapeDtypeStruct((b_run, n_pad), mxu_dtype),
        grid=(grid_b,),
        in_specs=[
            pl.BlockSpec((tb, K), lambda i: (i, 0)),   # x tile (native K width)
            pl.BlockSpec((K, h1), resident),           # w1
            pl.BlockSpec((1, h1), resident),           # b1
            pl.BlockSpec((h1, h2), resident),          # w2
            pl.BlockSpec((1, h2), resident),           # b2
            pl.BlockSpec((h2, n_pad), resident),       # w3 (lane-dense N)
            pl.BlockSpec((1, n_pad), resident),        # b3
        ],
        out_specs=pl.BlockSpec((tb, n_pad), lambda i: (i, 0)),
        compiler_params=pltpu.CompilerParams(
            dimension_semantics=("parallel",)),
    )(state, prep.w1, prep.b1, prep.w2, prep.b2, prep.w3, prep.b3)

    return out[:B, :prep.out_dim].astype(out_dtype)


def xavier_uniform(key, fan_in, fan_out, dtype=jnp.float32):
    # Matches torch.nn.init.xavier_uniform_: U(-a, a), a = sqrt(6/(fan_in+fan_out))
    a = math.sqrt(6.0 / (fan_in + fan_out))
    return jax.random.uniform(key, (fan_in, fan_out), dtype, minval=-a, maxval=a)


def init_dqn_params(key, input_dim, output_dim):
    k1, k2, k3 = jax.random.split(key, 3)
    w1 = xavier_uniform(k1, input_dim, H1)
    b1 = jnp.zeros((1, H1), jnp.float32)
    w2 = xavier_uniform(k2, H1, H2)
    b2 = jnp.zeros((1, H2), jnp.float32)
    w3 = xavier_uniform(k3, H2, output_dim)
    b3 = jnp.zeros((1, output_dim), jnp.float32)
    return (w1, b1, w2, b2, w3, b3)


def _reference(state, params):
    w1, b1, w2, b2, w3, b3 = params
    h = jnp.maximum(state @ w1 + b1, 0.0)
    h = jnp.maximum(h @ w2 + b2, 0.0)
    return h @ w3 + b3


if __name__ == "__main__":
    key = jax.random.PRNGKey(0)
    k_param, k_s1, k_s2, k_s3 = jax.random.split(key, 4)

    input_dim = 32   # e.g. a flattened state vector
    output_dim = 8   # number of discrete actions
    params = init_dqn_params(k_param, input_dim, output_dim)

    # One-time prep (hoisted out of the forward path).
    prep_f32 = prepare_dqn_params(params, mxu_dtype=jnp.float32)
    prep_bf16 = prepare_dqn_params(params, mxu_dtype=jnp.bfloat16)  # default path

    # --- small batch, f32: single 16-row block, strict numerical check ------
    batch = 8
    state = jax.random.normal(k_s1, (batch, input_dim), jnp.float32)
    out = jax.block_until_ready(dqn_forward(state, prep_f32))
    ref = _reference(state, params)
    assert out.shape == (batch, output_dim)
    assert jnp.allclose(out, ref, atol=1e-5, rtol=1e-5)

    # --- medium batch, f32: exercises grid=2 + ragged last block ------------
    batch3 = 40  # tb=32 -> grid=(2,), last block ragged (no batch padding)
    state3 = jax.random.normal(k_s3, (batch3, input_dim), jnp.float32)
    out3 = jax.block_until_ready(dqn_forward(state3, prep_f32))
    ref3 = _reference(state3, params)
    assert out3.shape == (batch3, output_dim)
    assert jnp.allclose(out3, ref3, atol=1e-5, rtol=1e-5)

    # --- larger batch, default bf16 MXU path (bf16 activations/weights, f32
    #     accumulation, bf16 writeback) ---------------------------------------
    batch2 = 300
    state2_f32 = jax.random.normal(k_s2, (batch2, input_dim), jnp.float32)
    state2 = state2_f32.astype(jnp.bfloat16)   # caller supplies bf16 inputs
    out2 = jax.block_until_ready(dqn_forward(state2, prep_bf16))
    ref2 = _reference(state2_f32, params)
    assert out2.shape == (batch2, output_dim)
    assert jnp.allclose(out2, ref2, atol=5e-2, rtol=5e-2)

    print("KERNEL_OK")
</pallas_src>

<mosaic_0001>
module attributes {stable_mosaic.version = 11 : i64} {
  func.func @_dqn_kernel(%arg0: i32, %arg1: memref<16x32xf32, #tpu.memory_space<vmem>>, %arg2: memref<32x128xf32, #tpu.memory_space<vmem>>, %arg3: memref<1x128xf32, #tpu.memory_space<vmem>>, %arg4: memref<128x256xf32, #tpu.memory_space<vmem>>, %arg5: memref<1x256xf32, #tpu.memory_space<vmem>>, %arg6: memref<256x128xf32, #tpu.memory_space<vmem>>, %arg7: memref<1x128xf32, #tpu.memory_space<vmem>>, %arg8: memref<16x128xf32, #tpu.memory_space<vmem>>) attributes {dimension_semantics = [#tpu.dimension_semantics<parallel>], iteration_bounds = array<i64: 1>, scalar_prefetch = 0 : i64, scratch_operands = 0 : i64, tpu.core_type = #tpu.core_type<tc>, window_params = [{transform_indices = @transform_0, window_bounds = array<i64: 16, 32>}, {pipeline_mode = #tpu.pipeline_mode<synchronous>, transform_indices = @transform_1, window_bounds = array<i64: 32, 128>}, {pipeline_mode = #tpu.pipeline_mode<synchronous>, transform_indices = @transform_2, window_bounds = array<i64: 1, 128>}, {pipeline_mode = #tpu.pipeline_mode<synchronous>, transform_indices = @transform_3, window_bounds = array<i64: 128, 256>}, {pipeline_mode = #tpu.pipeline_mode<synchronous>, transform_indices = @transform_4, window_bounds = array<i64: 1, 256>}, {pipeline_mode = #tpu.pipeline_mode<synchronous>, transform_indices = @transform_5, window_bounds = array<i64: 256, 128>}, {pipeline_mode = #tpu.pipeline_mode<synchronous>, transform_indices = @transform_6, window_bounds = array<i64: 1, 128>}, {transform_indices = @transform_7, window_bounds = array<i64: 16, 128>}]} {
    %c0 = arith.constant 0 : index
    %c0_0 = arith.constant 0 : index
    %0 = vector.load %arg1[%c0, %c0_0] : memref<16x32xf32, #tpu.memory_space<vmem>>, vector<16x32xf32>
    %c0_1 = arith.constant 0 : index
    %c0_2 = arith.constant 0 : index
    %1 = vector.load %arg2[%c0_1, %c0_2] : memref<32x128xf32, #tpu.memory_space<vmem>>, vector<32x128xf32>
    %cst = arith.constant dense<0.000000e+00> : vector<16x128xf32>
    %2 = tpu.matmul %0, %1, %cst {dimension_numbers = #tpu.dot_dimension_numbers<[1], [0], [0], [1], [0, 0, 1, 1], [], []>} : vector<16x32xf32>, vector<32x128xf32>, vector<16x128xf32> -> vector<16x128xf32>
    %c0_3 = arith.constant 0 : index
    %c0_4 = arith.constant 0 : index
    %3 = vector.load %arg3[%c0_3, %c0_4] : memref<1x128xf32, #tpu.memory_space<vmem>>, vector<1x128xf32>
    %4 = vector.broadcast %3 : vector<1x128xf32> to vector<16x128xf32>
    %5 = arith.addf %2, %4 : vector<16x128xf32>
    %cst_5 = arith.constant 0.000000e+00 : f32
    %6 = vector.broadcast %cst_5 : f32 to vector<16x128xf32>
    %7 = arith.maximumf %5, %6 : vector<16x128xf32>
    %c0_6 = arith.constant 0 : index
    %c0_7 = arith.constant 0 : index
    %8 = vector.load %arg4[%c0_6, %c0_7] : memref<128x256xf32, #tpu.memory_space<vmem>>, vector<128x256xf32>
    %cst_8 = arith.constant dense<0.000000e+00> : vector<16x256xf32>
    %9 = tpu.matmul %7, %8, %cst_8 {dimension_numbers = #tpu.dot_dimension_numbers<[1], [0], [0], [1], [0, 0, 1, 1], [], []>} : vector<16x128xf32>, vector<128x256xf32>, vector<16x256xf32> -> vector<16x256xf32>
    %c0_9 = arith.constant 0 : index
    %c0_10 = arith.constant 0 : index
    %10 = vector.load %arg5[%c0_9, %c0_10] : memref<1x256xf32, #tpu.memory_space<vmem>>, vector<1x256xf32>
    %11 = vector.broadcast %10 : vector<1x256xf32> to vector<16x256xf32>
    %12 = arith.addf %9, %11 : vector<16x256xf32>
    %cst_11 = arith.constant 0.000000e+00 : f32
    %13 = vector.broadcast %cst_11 : f32 to vector<16x256xf32>
    %14 = arith.maximumf %12, %13 : vector<16x256xf32>
    %c0_12 = arith.constant 0 : index
    %c0_13 = arith.constant 0 : index
    %15 = vector.load %arg6[%c0_12, %c0_13] : memref<256x128xf32, #tpu.memory_space<vmem>>, vector<256x128xf32>
    %cst_14 = arith.constant dense<0.000000e+00> : vector<16x128xf32>
    %16 = tpu.matmul %14, %15, %cst_14 {dimension_numbers = #tpu.dot_dimension_numbers<[1], [0], [0], [1], [0, 0, 1, 1], [], []>} : vector<16x256xf32>, vector<256x128xf32>, vector<16x128xf32> -> vector<16x128xf32>
    %c0_15 = arith.constant 0 : index
    %c0_16 = arith.constant 0 : index
    %17 = vector.load %arg7[%c0_15, %c0_16] : memref<1x128xf32, #tpu.memory_space<vmem>>, vector<1x128xf32>
    %18 = vector.broadcast %17 : vector<1x128xf32> to vector<16x128xf32>
    %19 = arith.addf %16, %18 : vector<16x128xf32>
    %c0_17 = arith.constant 0 : index
    %c0_18 = arith.constant 0 : index
    %20 = vector.load %arg8[%c0_17, %c0_18] : memref<16x128xf32, #tpu.memory_space<vmem>>, vector<16x128xf32>
    tpu.vector_store %arg8[%c0_17, %c0_18], %19 {strides = array<i32>} : memref<16x128xf32, #tpu.memory_space<vmem>>, vector<16x128xf32>,
    return
  }
  func.func @transform_0(%arg0: i32) -> (i32, i32) {
    %c0_i32 = arith.constant 0 : i32
    %c0_i32_0 = arith.constant 0 : i32
    return %arg0, %c0_i32 : i32, i32
  }
  func.func @transform_1(%arg0: i32) -> (i32, i32) {
    %c0_i32 = arith.constant 0 : i32
    %c0_i32_0 = arith.constant 0 : i32
    %c0_i32_1 = arith.constant 0 : i32
    return %c0_i32, %c0_i32_0 : i32, i32
  }
  func.func @transform_2(%arg0: i32) -> (i32, i32) {
    %c0_i32 = arith.constant 0 : i32
    %c0_i32_0 = arith.constant 0 : i32
    %c0_i32_1 = arith.constant 0 : i32
    return %c0_i32, %c0_i32_0 : i32, i32
  }
  func.func @transform_3(%arg0: i32) -> (i32, i32) {
    %c0_i32 = arith.constant 0 : i32
    %c0_i32_0 = arith.constant 0 : i32
    %c0_i32_1 = arith.constant 0 : i32
    return %c0_i32, %c0_i32_0 : i32, i32
  }
  func.func @transform_4(%arg0: i32) -> (i32, i32) {
    %c0_i32 = arith.constant 0 : i32
    %c0_i32_0 = arith.constant 0 : i32
    %c0_i32_1 = arith.constant 0 : i32
    return %c0_i32, %c0_i32_0 : i32, i32
  }
  func.func @transform_5(%arg0: i32) -> (i32, i32) {
    %c0_i32 = arith.constant 0 : i32
    %c0_i32_0 = arith.constant 0 : i32
    %c0_i32_1 = arith.constant 0 : i32
    return %c0_i32, %c0_i32_0 : i32, i32
  }
  func.func @transform_6(%arg0: i32) -> (i32, i32) {
    %c0_i32 = arith.constant 0 : i32
    %c0_i32_0 = arith.constant 0 : i32
    %c0_i32_1 = arith.constant 0 : i32
    return %c0_i32, %c0_i32_0 : i32, i32
  }
  func.func @transform_7(%arg0: i32) -> (i32, i32) {
    %c0_i32 = arith.constant 0 : i32
    %c0_i32_0 = arith.constant 0 : i32
    return %arg0, %c0_i32 : i32, i32
  }
}

</mosaic_0001>

<bundles_post_ra>
// kernel: tpu_custom_call.1
= control target key start
LH: loop header
LB: loop body
LE: loop exit
PB: predicated region body
PF: predicated region fallthrough
CT: control target
= control target key end

     0   :  { %12 = vsyncpa [#allocation3], 0  ;;  %s838_s0 = inlined_call_operand.hbm [shape: f32[16,32], index: 0, kind: input, shape index: {}]   ;;  %s839_s1 = inlined_call_operand.hbm [shape: f32[32,128], index: 1, kind: input, shape index: {}]   ;;  %s840_s2 = inlined_call_operand.vmem [shape: f32[1,128], index: 2, kind: input, shape index: {}]   ;;  %s841_s3 = inlined_call_operand.hbm [shape: f32[128,256], index: 3, kind: input, shape index: {}]   ;;  %s842_s4 = inlined_call_operand.vmem [shape: f32[1,256], index: 4, kind: input, shape index: {}]   ;;  %s843_s5 = inlined_call_operand.hbm [shape: f32[256,128], index: 5, kind: input, shape index: {}]   ;;  %s844_s6 = inlined_call_operand.vmem [shape: f32[1,128], index: 6, kind: input, shape index: {}]   ;;  %s845_s7 = inlined_call_operand.hbm [shape: f32[16,128], index: 7, kind: output, shape index: {}]  }
   0x1   :  { %13 = vsyncpa [#allocation6], 0 }
   0x2   :  { %14 = vsyncpa [#allocation9], 0 }
   0x3   :  { %15 = vsyncpa [#allocation4], 0  ;;  %s698_s24 = smov [#allocation5]   ;;  %s699_s26 = smov [#allocation2]  }
   0x4   :  { %s33_s25 = sshll.u32 %s698_s24, 4  ;;  %s21_s27 = sshll.u32 %s699_s26, 4  ;;  %s34_s25 = int_to_ptr.vmem [resolvable:$true] %s33_s25  ;;  %s748_s27 = int_to_ptr.vmem [resolvable:$true] %s21_s27 }
   0x5   :  { %s580_s30 = scalar_lea.hbm %s839_s1, 512 }
   0x6   :  { %p581_p0 = scmp.ne.s32.totalorder %s839_s1, %s580_s30  ;;  %p584_p1 = scmp.lt.u32.totalorder %s580_s30, %s839_s1 }
   0x8   :  { %p586_p2 = pnand %p584_p1, %p581_p0 }
   0xa   :  { %589 = shalt.err (!%p586_p2)
}
   0xb   :  { %s590_s12 = scalar_lea.vmem %s34_s25, 512  ;;  %p595_p4 = scmp.lt.s32.totalorder %s34_s25, %s34_s25 }
   0xc   :  { %p591_p3 = scmp.ne.s32.totalorder %s34_s25, %s590_s12  ;;  %p596_p5 = scmp.lt.s32.totalorder %s590_s12, %s590_s12 }
   0xe   :  { %p597_p6 = por %p596_p5, %p595_p4 }
  0x10   :  { %p598_p7 = pnand %p597_p6, %p591_p3 }
  0x12   :  { %601 = shalt.err (!%p598_p7)
}
  0x13   :  { %s700_s13 = smov 128   ;;  %s701_s14 = smov 8  }
  0x14   :  { %39 = dma.hbm_to_vmem [thread:$0]  %s839_s1, 512, %s34_s25, [#allocation6], %s700_s13, %s700_s13, %s701_s14  }
  0x15   :  { %s602_s19 = scalar_lea.hbm %s838_s0, 256 }
  0x16   :  { %p603_p8 = scmp.ne.s32.totalorder %s838_s0, %s602_s19  ;;  %p606_p9 = scmp.lt.u32.totalorder %s602_s19, %s838_s0 }
  0x18   :  { %p608_p10 = pnand %p606_p9, %p603_p8 }
  0x1a   :  { %611 = shalt.err (!%p608_p10)
}
  0x1b   :  { %s612_s24 = scalar_lea.vmem %s748_s27, 256  ;;  %p617_p12 = scmp.lt.s32.totalorder %s748_s27, %s748_s27 }
  0x1c   :  { %p613_p11 = scmp.ne.s32.totalorder %s748_s27, %s612_s24  ;;  %p618_p13 = scmp.lt.s32.totalorder %s612_s24, %s612_s24 }
  0x1e   :  { %p619_p0 = por %p618_p13, %p617_p12 }
  0x20   :  { %p620_p1 = pnand %p619_p0, %p613_p11 }
  0x22   :  { %623 = shalt.err (!%p620_p1)
}
  0x23   :  { %27 = dma.hbm_to_vmem [thread:$0]  %s838_s0, 256, %s748_s27, [#allocation3], %s700_s13, %s700_s13, %s701_s14  }
  0x24   :  { %s702_s26 = smov [#allocation7]   ;;  %s624_s8 = scalar_lea.hbm %s841_s3, 4096 }
  0x25   :  { %s47_s28 = sshll.u32 %s702_s26, 4  ;;  %p625_p2 = scmp.ne.s32.totalorder %s841_s3, %s624_s8  ;;  %s48_s28 = int_to_ptr.vmem [resolvable:$true] %s47_s28 }
  0x26   :  { %p628_p3 = scmp.lt.u32.totalorder %s624_s8, %s841_s3 }
  0x28   :  { %p630_p4 = pnand %p628_p3, %p625_p2 }
  0x2a   :  { %633 = shalt.err (!%p630_p4)
}
  0x2b   :  { %s634_s15 = scalar_lea.vmem %s48_s28, 4096  ;;  %p639_p6 = scmp.lt.s32.totalorder %s48_s28, %s48_s28 }
  0x2c   :  { %p635_p5 = scmp.ne.s32.totalorder %s48_s28, %s634_s15  ;;  %p640_p7 = scmp.lt.s32.totalorder %s634_s15, %s634_s15 }
  0x2e   :  { %p641_p8 = por %p640_p7, %p639_p6 }
  0x30   :  { %p642_p9 = pnand %p641_p8, %p635_p5 }
  0x32   :  { %645 = shalt.err (!%p642_p9)
}
  0x33   :  { %s703_s0 = smov 256   ;;  %s704_s27 = smov 16  }
  0x34   :  { %53 = dma.hbm_to_vmem [thread:$0]  %s841_s3, 4096, %s48_s28, [#allocation6], %s703_s0, %s703_s0, %s704_s27  }
  0x35   :  { %s705_s18 = smov [#allocation8]   ;;  %s646_s22 = scalar_lea.hbm %s843_s5, 4096 }
  0x36   :  { %s61_s19 = sshll.u32 %s705_s18, 4  ;;  %p647_p10 = scmp.ne.s32.totalorder %s843_s5, %s646_s22  ;;  %s62_s19 = int_to_ptr.vmem [resolvable:$true] %s61_s19 }
  0x37   :  { %p650_p11 = scmp.lt.u32.totalorder %s646_s22, %s843_s5 }
  0x39   :  { %p652_p12 = pnand %p650_p11, %p647_p10 }
  0x3b   :  { %655 = shalt.err (!%p652_p12)
}
  0x3c   :  { %s656_s26 = scalar_lea.vmem %s62_s19, 4096  ;;  %p661_p0 = scmp.lt.s32.totalorder %s62_s19, %s62_s19 }
  0x3d   :  { %p657_p13 = scmp.ne.s32.totalorder %s62_s19, %s656_s26  ;;  %p662_p1 = scmp.lt.s32.totalorder %s656_s26, %s656_s26 }
  0x3f   :  { %p663_p2 = por %p662_p1, %p661_p0 }
  0x41   :  { %p664_p3 = pnand %p663_p2, %p657_p13 }
  0x43   :  { %667 = shalt.err (!%p664_p3)
}
  0x44   :  { %67 = dma.hbm_to_vmem [thread:$0]  %s843_s5, 4096, %s62_s19, [#allocation9], %s700_s13, %s700_s13, %s701_s14  }
  0x45   :  { %690 = dma.done.wait [#allocation3], 256  }
  0x46   :  { %691 = vsyncadd [#allocation3], 4294967040 }
  0x47   :  { %692 = dma.done.wait [#allocation6], 4608  }
  0x48   :  { %693 = vsyncadd [#allocation6], 4294962688 }
  0x49   :  { %694 = dma.done.wait [#allocation9], 4096  }
  0x4a   :  { %695 = vsyncadd [#allocation9], 4294963200  ;;  %vm95_vm0 = vcmask 261120   ;;  %v84_v0 = vld [vmem:[#allocation5] sm:$0xff]  ;;  %v85_v1 = vld [vmem:[#allocation5 + $0x8] sm:$0xff]  ;;  %v706_v56 = vmov 0.0  }
  0x4b   :  { %v86_v2 = vld [vmem:[#allocation5 + $0x10] sm:$0xff]  ;;  %v498_v3 = vpack.c.bf16 %v85_v1, %v84_v0  ;;  %v87_v4 = vld [vmem:[#allocation5 + $0x18] sm:$0xff]  ;;  %v180_v7 = vld [vmem:[#allocation7 + $0x8] sm:$0xff]  ;;  %287 = vmatprep.mubr.f32.mxu1 %v706_v56  ;;  %s707_s9 = smov [#allocation10]  }
  0x4c   :  { %v82_v5 = vld [vmem:[#allocation2] sm:$0xff]  ;;  %v502_v6 = vpack.c.bf16 %v87_v4, %v86_v2  ;;  %v182_v8 = vld [vmem:[#allocation7 + $0x18] sm:$0xff]  ;;  %v179_v9 = vld [vmem:[#allocation7] sm:$0xff]  ;;  %s425_s10 = sshll.u32 %s707_s9, 4  ;;  %s426_s10 = int_to_ptr.vmem [resolvable:$true] %s425_s10 }
  0x4d   :  { %495 = vmatprep.mubr.msk.f32.mxu0 %vm95_vm0, %v82_v5  ;;  %499 = vmatprep.subr.bf16.mxu0 %v498_v3  ;;  %v506_v10 = vpack.c.bf16 %v182_v8, %v180_v7  ;;  %v181_v11 = vld [vmem:[#allocation7 + $0x10] sm:$0xff]  ;;  %v184_v12 = vld [vmem:[#allocation7 + $0x28] sm:$0xff]  ;;  %v186_v13 = vld [vmem:[#allocation7 + $0x38] sm:$0xff]  ;;  %s668_s11 = scalar_lea.vmem %s426_s10, 256  ;;  %p673_p5 = scmp.lt.s32.totalorder %s426_s10, %s426_s10 }
  0x4e   :  { %501 = vmatpush3.bf16.msra.mxu0 %v498_v3  ;;  %v508_v14 = vpack.c.bf16 %v181_v11, %v179_v9  ;;  %v510_v15 = vpack.c.bf16 %v186_v13, %v184_v12  ;;  %v183_v16 = vld [vmem:[#allocation7 + $0x20] sm:$0xff]  ;;  %v185_v17 = vld [vmem:[#allocation7 + $0x30] sm:$0xff]  ;;  %v188_v18 = vld [vmem:[#allocation7 + $0x48] sm:$0xff]  ;;  %p669_p4 = scmp.ne.s32.totalorder %s426_s10, %s668_s11  ;;  %p674_p6 = scmp.lt.s32.totalorder %s668_s11, %s668_s11 }
  0x4f   :  { %503 = vmatprep.subr.bf16.mxu0 %v502_v6  ;;  %507 = vmatprep.subr.bf16.mxu1 %v506_v10  ;;  %v190_v19 = vld [vmem:[#allocation7 + $0x58] sm:$0xff]  ;;  %v512_v20 = vpack.c.bf16 %v185_v17, %v183_v16  ;;  %v187_v22 = vld [vmem:[#allocation7 + $0x40] sm:$0xff]  ;;  %v189_v23 = vld [vmem:[#allocation7 + $0x50] sm:$0xff] }
  0x50   :  { %509 = vmatpush1.bf16.msra.mxu1 %v508_v14  ;;  %v514_v21 = vpack.c.bf16 %v190_v19, %v188_v18  ;;  %v83_v24 = vld [vmem:[#allocation2 + $0x8] sm:$0xff]  ;;  %v192_v25 = vld [vmem:[#allocation7 + $0x68] sm:$0xff]  ;;  %v516_v27 = vpack.c.bf16 %v189_v23, %v187_v22  ;;  %v191_v29 = vld [vmem:[#allocation7 + $0x60] sm:$0xff]  ;;  %p675_p7 = por %p674_p6, %p673_p5 }
  0x51   :  { %511 = vmatprep.subr.bf16.mxu1 %v510_v15  ;;  %v194_v26 = vld [vmem:[#allocation7 + $0x78] sm:$0xff]  ;;  %v193_v30 = vld [vmem:[#allocation7 + $0x70] sm:$0xff]  ;;  %v196_v31 = vld [vmem:[#allocation7 + $0x88] sm:$0xff] }
  0x52   :  { %505 = vmatpush3.bf16.msra.mxu0 %v502_v6  ;;  %v518_v28 = vpack.c.bf16 %v194_v26, %v192_v25  ;;  %v198_v32 = vld [vmem:[#allocation7 + $0x98] sm:$0xff]  ;;  %v520_v33 = vpack.c.bf16 %v193_v30, %v191_v29  ;;  %v195_v35 = vld [vmem:[#allocation7 + $0x80] sm:$0xff]  ;;  %v197_v36 = vld [vmem:[#allocation7 + $0x90] sm:$0xff]  ;;  %p676_p8 = pnand %p675_p7, %p669_p4 }
  0x53   :  { %v522_v34 = vpack.c.bf16 %v198_v32, %v196_v31  ;;  %v200_v37 = vld [vmem:[#allocation7 + $0xa8] sm:$0xff]  ;;  %v202_v38 = vld [vmem:[#allocation7 + $0xb8] sm:$0xff]  ;;  %v524_v39 = vpack.c.bf16 %v197_v36, %v195_v35  ;;  %v199_v41 = vld [vmem:[#allocation7 + $0xa0] sm:$0xff] }
  0x54   :  { %513 = vmatpush1.bf16.msra.mxu1 %v512_v20  ;;  %v526_v40 = vpack.c.bf16 %v202_v38, %v200_v37  ;;  %v201_v42 = vld [vmem:[#allocation7 + $0xb0] sm:$0xff]  ;;  %v204_v43 = vld [vmem:[#allocation7 + $0xc8] sm:$0xff]  ;;  %v206_v44 = vld [vmem:[#allocation7 + $0xd8] sm:$0xff] }
  0x55   :  { %496 = vmatmul.mubr.msk.f32.vlgmr.msra.gmra.mrb[0].mxu0 %vm95_vm0, %v83_v24  ;;  %515 = vmatprep.subr.bf16.mxu1 %v514_v21  ;;  %v528_v45 = vpack.c.bf16 %v201_v42, %v199_v41  ;;  %v530_v46 = vpack.c.bf16 %v206_v44, %v204_v43  ;;  %v203_v47 = vld [vmem:[#allocation7 + $0xc0] sm:$0xff]  ;;  %v205_v48 = vld [vmem:[#allocation7 + $0xd0] sm:$0xff]  ;;  %v208_v50 = vld [vmem:[#allocation7 + $0xe8] sm:$0xff] }
  0x56   :  { %v532_v49 = vpack.c.bf16 %v205_v48, %v203_v47  ;;  %v210_v51 = vld [vmem:[#allocation7 + $0xf8] sm:$0xff]  ;;  %v207_v53 = vld [vmem:[#allocation7 + $0xe0] sm:$0xff]  ;;  %v209_v54 = vld [vmem:[#allocation7 + $0xf0] sm:$0xff]  ;;  %v213_v48 = vlaneseq }
  0x57   :  { %v534_v52 = vpack.c.bf16 %v210_v51, %v208_v50  ;;  %v536_v55 = vpack.c.bf16 %v209_v54, %v207_v53  ;;  %v320_v57 = vld [vmem:[#allocation8 + $0x80] sm:$0xff]  ;;  %v321_v58 = vld [vmem:[#allocation8 + $0x88] sm:$0xff]  ;;  %v322_v62 = vld [vmem:[#allocation8 + $0x90] sm:$0xff] }
  0x58   :  { %517 = vmatpush1.bf16.msra.mxu1 %v516_v27  ;;  %v304_v59 = vld [vmem:[#allocation8] sm:$0xff]  ;;  %v538_v60 = vpack.c.bf16 %v321_v58, %v320_v57  ;;  %v305_v61 = vld [vmem:[#allocation8 + $0x8] sm:$0xff]  ;;  %v323_v63 = vld [vmem:[#allocation8 + $0x98] sm:$0xff] }
  0x59   :  { %519 = vmatprep.subr.bf16.mxu1 %v518_v28  ;;  %v540_v0 = vpack.c.bf16 %v305_v61, %v304_v59  ;;  %v542_v1 = vpack.c.bf16 %v323_v63, %v322_v62  ;;  %v306_v2 = vld [vmem:[#allocation8 + $0x10] sm:$0xff]  ;;  %v307_v3 = vld [vmem:[#allocation8 + $0x18] sm:$0xff]  ;;  %v324_v4 = vld [vmem:[#allocation8 + $0xa0] sm:$0xff] }
  0x5a   :  { %539 = vmatprep.subr.bf16.mxu0 %v538_v60  ;;  %v325_v5 = vld [vmem:[#allocation8 + $0xa8] sm:$0xff]  ;;  %v544_v6 = vpack.c.bf16 %v307_v3, %v306_v2  ;;  %v308_v8 = vld [vmem:[#allocation8 + $0x20] sm:$0xff]  ;;  %v326_v10 = vld [vmem:[#allocation8 + $0xb0] sm:$0xff] }
  0x5b   :  { %541 = vmatpush3.bf16.msra.mxu0 %v540_v0  ;;  %v546_v7 = vpack.c.bf16 %v325_v5, %v324_v4  ;;  %v309_v9 = vld [vmem:[#allocation8 + $0x28] sm:$0xff]  ;;  %v327_v11 = vld [vmem:[#allocation8 + $0xb8] sm:$0xff]  ;;  %v310_v14 = vld [vmem:[#allocation8 + $0x30] sm:$0xff] }
  0x5c   :  { %521 = vmatpush1.bf16.msra.mxu1 %v520_v33  ;;  %543 = vmatprep.subr.bf16.mxu0 %v542_v1  ;;  %v548_v12 = vpack.c.bf16 %v309_v9, %v308_v8  ;;  %v550_v13 = vpack.c.bf16 %v327_v11, %v326_v10  ;;  %v311_v15 = vld [vmem:[#allocation8 + $0x38] sm:$0xff]  ;;  %v328_v16 = vld [vmem:[#allocation8 + $0xc0] sm:$0xff]  ;;  %v329_v17 = vld [vmem:[#allocation8 + $0xc8] sm:$0xff] }
  0x5d   :  { %523 = vmatprep.subr.bf16.mxu1 %v522_v34  ;;  %v552_v18 = vpack.c.bf16 %v311_v15, %v310_v14  ;;  %v554_v19 = vpack.c.bf16 %v329_v17, %v328_v16  ;;  %v312_v20 = vld [vmem:[#allocation8 + $0x40] sm:$0xff]  ;;  %v313_v21 = vld [vmem:[#allocation8 + $0x48] sm:$0xff]  ;;  %v330_v22 = vld [vmem:[#allocation8 + $0xd0] sm:$0xff] }
  0x5e   :  { %v331_v23 = vld [vmem:[#allocation8 + $0xd8] sm:$0xff]  ;;  %v556_v24 = vpack.c.bf16 %v313_v21, %v312_v20  ;;  %v314_v26 = vld [vmem:[#allocation8 + $0x50] sm:$0xff]  ;;  %v332_v28 = vld [vmem:[#allocation8 + $0xe0] sm:$0xff] }
  0x5f   :  { %545 = vmatpush3.bf16.msra.mxu0 %v544_v6  ;;  %v558_v25 = vpack.c.bf16 %v331_v23, %v330_v22  ;;  %v315_v27 = vld [vmem:[#allocation8 + $0x58] sm:$0xff]  ;;  %v333_v29 = vld [vmem:[#allocation8 + $0xe8] sm:$0xff]  ;;  %v439_v32 = vld [vmem:[%s840_s2] ss:$0 sm:$0xff] }
  0x60   :  { %525 = vmatpush1.bf16.msra.mxu1 %v524_v39  ;;  %547 = vmatprep.subr.bf16.mxu0 %v546_v7  ;;  %v560_v30 = vpack.c.bf16 %v315_v27, %v314_v26  ;;  %v562_v31 = vpack.c.bf16 %v333_v29, %v332_v28  ;;  %v316_v39 = vld [vmem:[#allocation8 + $0x60] sm:$0xff]  ;;  %v334_v42 = vld [vmem:[#allocation8 + $0xf0] sm:$0xff]  ;;  %v335_v43 = vld [vmem:[#allocation8 + $0xf8] sm:$0xff] }
  0x61   :  { %527 = vmatprep.subr.bf16.mxu1 %v526_v40  ;;  %v317_v40 = vld [vmem:[#allocation8 + $0x68] sm:$0xff]  ;;  %v566_v44 = vpack.c.bf16 %v335_v43, %v334_v42  ;;  %v211_v51 = vld [vmem:[%s842_s4] sm:$0x3] }
  0x62   :  { %v564_v41 = vpack.c.bf16 %v317_v40, %v316_v39  ;;  %v442_v4 = vld [vmem:[%s844_s6] ss:$0 sm:$0xff] }
  0x63   :  { %549 = vmatpush3.bf16.msra.mxu0 %v548_v12 }
  0x64   :  { %529 = vmatpush1.bf16.msra.mxu1 %v528_v45  ;;  %551 = vmatprep.subr.bf16.mxu0 %v550_v13  ;;  %v318_v45 = vld [vmem:[#allocation8 + $0x70] sm:$0xff] }
  0x65   :  { %531 = vmatprep.subr.bf16.mxu1 %v530_v46  ;;  %v319_v46 = vld [vmem:[#allocation8 + $0x78] sm:$0xff] }
  0x66   :  { %v568_v47 = vpack.c.bf16 %v319_v46, %v318_v45 }
  0x67   :  { %553 = vmatpush3.bf16.msra.mxu0 %v552_v18 }
  0x68   :  { %533 = vmatpush1.bf16.msra.mxu1 %v532_v49  ;;  %555 = vmatprep.subr.bf16.mxu0 %v554_v19  ;;  %v214_v49 = vshrl.u32 %v213_v48, 7 }
  0x69   :  { %535 = vmatprep.subr.bf16.mxu1 %v534_v52 }
  0x6a   :  { %v215_v50 = vsub.s32 0, %v214_v49  ;;  %v219_v52 = vsub.s32 1, %v214_v49 }
  0x6b   :  { %557 = vmatpush3.bf16.msra.mxu0 %v556_v24 }
  0x6c   :  { %537 = vmatpush1.bf16.msra.mxu1 %v536_v55  ;;  %559 = vmatprep.subr.bf16.mxu0 %v558_v25  ;;  %v216_v53 = vrot.slane %v211_v51, %v215_v50  ;;  %v220_v54 = vrot.slane %v211_v51, %v219_v52 }
  0x6f   :  { %561 = vmatpush3.bf16.msra.mxu0 %v560_v30 }
  0x70   :  { %563 = vmatprep.subr.bf16.mxu0 %v562_v31 }
  0x73   :  { %565 = vmatpush3.bf16.msra.mxu0 %v564_v41 }
  0x74   :  { %567 = vmatprep.subr.bf16.mxu0 %v566_v44 }
  0x77   :  { %569 = vmatpush3.bf16.msra.mxu0 %v568_v47 }
 0x128   :  { %v497_v33 = vpop.f32.mrb[0].mxu0 }
 0x129   :  { %v168_v34 = vpop.f32.mrb[1].mxu0  ;;  %v174_v36 = vadd.f32 %v497_v33, %v439_v32 }
 0x12a   :  { %v169_v35 = vadd.f32 %v439_v32, %v168_v34 }
 0x12b   :  { %v178_v38 = vmax.f32 %v174_v36, 0.0 }
 0x12c   :  { %v177_v37 = vmax.f32 %v169_v35, 0.0 }
 0x12e   :  { %288 = vmatmul.mubr.f32.vlgmr.msra.gmra.mrb[0].mxu1 %v177_v37 }
 0x12f   :  { %293 = vmatprep.mubr.f32.mxu1 %v706_v56 }
 0x132   :  { %294 = vmatmul.mubr.f32.gmra.mrb[2].mxu1 %v178_v38 }
 0x201   :  { %v289_v55 = vpop.f32.mrb[0].mxu1 }
 0x202   :  { %v290_v56 = vadd.f32 %v289_v55, %v216_v53  ;;  %v291_v57 = vpop.f32.mrb[1].mxu1 }
 0x203   :  { %v292_v58 = vadd.f32 %v291_v57, %v220_v54 }
 0x204   :  { %v300_v61 = vmax.f32 %v290_v56, 0.0 }
 0x205   :  { %v301_v59 = vmax.f32 %v292_v58, 0.0  ;;  %v295_v60 = vpop.f32.mrb[2].mxu1 }
 0x206   :  { %v296_v62 = vadd.f32 %v295_v60, %v216_v53  ;;  %v297_v63 = vpop.f32.mrb[3].mxu1 }
 0x207   :  { %v298_v0 = vadd.f32 %v297_v63, %v220_v54  ;;  %407 = vmatprep.mubr.f32.mxu0 %v301_v59 }
 0x208   :  { %408 = vmatmul.mubr.f32.vlgmr.msra.gmra.mrb[2].mxu0 %v300_v61  ;;  %v302_v2 = vmax.f32 %v296_v62, 0.0 }
 0x209   :  { %v303_v1 = vmax.f32 %v298_v0, 0.0 }
 0x20b   :  { %412 = vmatprep.mubr.f32.mxu0 %v303_v1 }
 0x20c   :  { %413 = vmatmul.mubr.f32.gmra.mrb[4].mxu0 %v302_v2 }
 0x2db   :  { %v481_v3 = vpop.f32.mrb[2].mxu0 }
 0x2dc   :  { %v482_v5 = vpop.f32.mrb[3].mxu0 }
 0x2dd   :  { %v483_v6 = vadd.f32 %v482_v5, %v481_v3 }
 0x2df   :  { %v410_v7 = vadd.f32 %v483_v6, %v442_v4  ;;  %v484_v8 = vpop.f32.mrb[4].mxu0 }
 0x2e0   :  { %v485_v9 = vpop.f32.mrb[5].mxu0 }
 0x2e1   :  { %418 = vst [vmem:[#allocation10] sm:$0xff] %v410_v7  ;;  %v486_v10 = vadd.f32 %v485_v9, %v484_v8 }
 0x2e3   :  { %v415_v11 = vadd.f32 %v486_v10, %v442_v4 }
 0x2e5   :  { %419 = vst [vmem:[#allocation10 + $0x8] sm:$0xff] %v415_v11 }
 0x2e6   :  { %679 = shalt.err (!%p676_p8)
}
 0x2e7   :  { %s680_s15 = scalar_lea.hbm %s845_s7, 256 }
 0x2e8   :  { %p681_p9 = scmp.ne.s32.totalorder %s845_s7, %s680_s15  ;;  %p684_p10 = scmp.lt.u32.totalorder %s680_s15, %s845_s7 }
 0x2ea   :  { %p686_p11 = pnand %p684_p10, %p681_p9 }
 0x2ec   :  { %689 = shalt.err (!%p686_p11)
}
 0x2ed   :  { %431 = dma.vmem_to_hbm [thread:$0]  %s426_s10, 256, %s845_s7, [#allocation4], %s700_s13, %s700_s13, %s701_s14  }
 0x2ee   :  { %696 = dma.done.wait [#allocation4], 256  }
 0x2ef   :  { %697 = vsyncadd [#allocation4], 4294967040 }
 0x2f0   :  { %435 = vsyncpa [#allocation3], 1 }
 0x2f1   :  { %436 = vsyncpa [#allocation6], 1 }
 0x2f2   :  { %437 = vsyncpa [#allocation9], 1 }
 0x2f3   :  { %438 = vsyncpa [#allocation4], 1 }

</bundles_post_ra>
